<compile_context>
chip_gen: v7x
topology: tpu7x:2x2x1
jax: 0.10.0
libtpu: 0.0.40
codegen_flags: <defaults>
</compile_context>

<pallas_src>
from functools import partial

import jax
import jax.numpy as jnp
from jax.experimental import pallas as pl
from jax.experimental.pallas import tpu as pltpu


def _gather_chunk_kernel(idx_ref, emb_hbm, out_hbm, sem, *, chunk):
    """One grid step gathers `chunk` rows: emb[idx[row]] -> out[row, :], HBM -> HBM.

    idx_ref:  SMEM (B_pad,) int32           -- class ids (scalar-prefetched)
    emb_hbm:  HBM  (n_classes, D)           -- embedding table, left in place
    out_hbm:  HBM  (B_pad, D)               -- gathered embeddings, written by DMA only
    sem:      DMA semaphores, shape (chunk,)
    """
    base = pl.program_id(0) * chunk

    # Issue all row copies first (all SMEM reads happen before any wait), keeping the
    # descriptors so the wait loop reuses them instead of rebuilding.
    copies = []
    for r in range(chunk):
        row = base + r
        cp = pltpu.make_async_copy(
            emb_hbm.at[pl.ds(idx_ref[row], 1), :],   # (1, D) source row in HBM
            out_hbm.at[pl.ds(row, 1), :],            # (1, D) destination row in HBM
            sem.at[r],
        )
        cp.start()
        copies.append(cp)

    for cp in copies:
        cp.wait()


def embedding_lookup_pallas(embedding, idx, *, chunk=128):
    """embedding: (n_classes, D); idx: (B,) int -> (B, 1, D)."""
    B = idx.shape[0]
    _, D = embedding.shape

    chunk = max(1, min(chunk, B))
    n_chunks = -(-B // chunk)          # ceil div (static Python ints)
    B_pad = n_chunks * chunk

    idx = idx.astype(jnp.int32)
    if B_pad != B:
        # Pad with class 0 (always a valid row); padded rows are sliced off below.
        idx = jnp.pad(idx, (0, B_pad - B))

    out = pl.pallas_call(
        partial(_gather_chunk_kernel, chunk=chunk),
        out_shape=jax.ShapeDtypeStruct((B_pad, D), embedding.dtype),
        grid_spec=pltpu.PrefetchScalarGridSpec(
            num_scalar_prefetch=1,                     # class ids -> SMEM before grid runs
            grid=(n_chunks,),
            in_specs=[pl.BlockSpec(memory_space=pl.ANY)],   # table stays in HBM
            out_specs=pl.BlockSpec(memory_space=pl.ANY),    # output stays in HBM (direct DMA)
            scratch_shapes=[pltpu.SemaphoreType.DMA((chunk,))],
        ),
        compiler_params=pltpu.CompilerParams(
            dimension_semantics=("parallel",),         # v7x: split chunks across both TCs
        ),
    )(idx, embedding)

    # [:, None, :] of the PyTorch forward — metadata-only reshape in the wrapper.
    return out[:B, None, :]


# ------------------------------------ module-equivalent glue -------------------------------------
def init_params(rng, n_classes, embed_dim, key="class"):
    # nn.Embedding default init: weights ~ N(0, 1)
    return {
        "key": key,
        "embedding": jax.random.normal(rng, (n_classes, embed_dim), jnp.float32),
    }


def class_embedder(params, batch, key=None):
    """Equivalent of ClassEmbedder.forward: returns (B, 1, embed_dim)."""
    if key is None:
        key = params["key"]
    c = batch[key]                                            # (B,) integer class ids
    # TODO(synk): if the caller duplicates ids for classifier-free guidance, gather the
    # unique half here and broadcast in the wrapper to halve the DMA count.
    return embedding_lookup_pallas(params["embedding"], c)    # (B, 1, embed_dim)


if __name__ == "__main__":
    root = jax.random.PRNGKey(0)
    k_emb, k_idx = jax.random.split(root)

    n_classes, embed_dim, batch_size = 1000, 128, 2
    params = init_params(k_emb, n_classes, embed_dim)
    cls_ids = jax.random.randint(k_idx, (batch_size,), 0, n_classes, dtype=jnp.int32)
    batch = {"class": cls_ids}

    out = class_embedder(params, batch)
    out = jax.block_until_ready(out)

    assert out.shape == (batch_size, 1, embed_dim), out.shape
    ref = params["embedding"][cls_ids][:, None, :]            # plain-JAX reference gather
    assert bool(jnp.allclose(out, ref)), "mismatch vs reference embedding lookup"
    print("KERNEL_OK")
</pallas_src>

<mosaic_0001>
module attributes {stable_mosaic.version = 11 : i64} {
  func.func @_gather_chunk_kernel(%arg0: i32, %arg1: memref<2xi32, #tpu.memory_space<smem>>, %arg2: memref<1000x128xf32, #tpu.memory_space<any>>, %arg3: memref<2x128xf32, #tpu.memory_space<any>>, %arg4: memref<2x!tpu.dma_semaphore, #tpu.memory_space<semaphore_mem>>) attributes {dimension_semantics = [#tpu.dimension_semantics<parallel>], iteration_bounds = array<i64: 1>, scalar_prefetch = 1 : i64, scratch_operands = 1 : i64, tpu.core_type = #tpu.core_type<tc>, window_params = [{}, {}]} {
    %c2_i32 = arith.constant 2 : i32
    %0 = arith.muli %arg0, %c2_i32 : i32
    %c0_i32 = arith.constant 0 : i32
    %1 = arith.addi %0, %c0_i32 : i32
    %2 = arith.index_cast %1 : i32 to index
    %3 = memref.load %arg1[%2] : memref<2xi32, #tpu.memory_space<smem>>
    %c0_i32_0 = arith.constant 0 : i32
    %c0_i32_1 = arith.constant 0 : i32
    %4 = tpu.memref_slice %arg2[%3, %c0_i32_1] : memref<1000x128xf32, #tpu.memory_space<any>> -> memref<1x128xf32, #tpu.memory_space<any>>
    %c0_i32_2 = arith.constant 0 : i32
    %5 = tpu.memref_slice %arg3[%1, %c0_i32_2] : memref<2x128xf32, #tpu.memory_space<any>> -> memref<1x128xf32, #tpu.memory_space<any>>
    %6 = tpu.memref_slice %arg4[%c0_i32_0] : memref<2x!tpu.dma_semaphore, #tpu.memory_space<semaphore_mem>> -> memref<1x!tpu.dma_semaphore, #tpu.memory_space<semaphore_mem>>
    %7 = tpu.memref_squeeze %6 : memref<1x!tpu.dma_semaphore, #tpu.memory_space<semaphore_mem>> -> memref<!tpu.dma_semaphore, #tpu.memory_space<semaphore_mem>>
    tpu.enqueue_dma source(%4 : memref<1x128xf32, #tpu.memory_space<any>>) target(%5 : memref<1x128xf32, #tpu.memory_space<any>>) target_semaphore(%7 : memref<!tpu.dma_semaphore, #tpu.memory_space<semaphore_mem>>)
    %c1_i32 = arith.constant 1 : i32
    %8 = arith.addi %0, %c1_i32 : i32
    %9 = arith.index_cast %8 : i32 to index
    %10 = memref.load %arg1[%9] : memref<2xi32, #tpu.memory_space<smem>>
    %c1_i32_3 = arith.constant 1 : i32
    %c0_i32_4 = arith.constant 0 : i32
    %11 = tpu.memref_slice %arg2[%10, %c0_i32_4] : memref<1000x128xf32, #tpu.memory_space<any>> -> memref<1x128xf32, #tpu.memory_space<any>>
    %c0_i32_5 = arith.constant 0 : i32
    %12 = tpu.memref_slice %arg3[%8, %c0_i32_5] : memref<2x128xf32, #tpu.memory_space<any>> -> memref<1x128xf32, #tpu.memory_space<any>>
    %13 = tpu.memref_slice %arg4[%c1_i32_3] : memref<2x!tpu.dma_semaphore, #tpu.memory_space<semaphore_mem>> -> memref<1x!tpu.dma_semaphore, #tpu.memory_space<semaphore_mem>>
    %14 = tpu.memref_squeeze %13 : memref<1x!tpu.dma_semaphore, #tpu.memory_space<semaphore_mem>> -> memref<!tpu.dma_semaphore, #tpu.memory_space<semaphore_mem>>
    tpu.enqueue_dma source(%11 : memref<1x128xf32, #tpu.memory_space<any>>) target(%12 : memref<1x128xf32, #tpu.memory_space<any>>) target_semaphore(%14 : memref<!tpu.dma_semaphore, #tpu.memory_space<semaphore_mem>>)
    %c0_i32_6 = arith.constant 0 : i32
    %c0_i32_7 = arith.constant 0 : i32
    %15 = tpu.memref_slice %arg2[%3, %c0_i32_7] : memref<1000x128xf32, #tpu.memory_space<any>> -> memref<1x128xf32, #tpu.memory_space<any>>
    %c0_i32_8 = arith.constant 0 : i32
    %16 = tpu.memref_slice %arg3[%1, %c0_i32_8] : memref<2x128xf32, #tpu.memory_space<any>> -> memref<1x128xf32, #tpu.memory_space<any>>
    %17 = tpu.memref_slice %arg4[%c0_i32_6] : memref<2x!tpu.dma_semaphore, #tpu.memory_space<semaphore_mem>> -> memref<1x!tpu.dma_semaphore, #tpu.memory_space<semaphore_mem>>
    %18 = tpu.memref_squeeze %17 : memref<1x!tpu.dma_semaphore, #tpu.memory_space<semaphore_mem>> -> memref<!tpu.dma_semaphore, #tpu.memory_space<semaphore_mem>>
    tpu.wait_dma2 semaphore(%18 : memref<!tpu.dma_semaphore, #tpu.memory_space<semaphore_mem>>) src(%15 : memref<1x128xf32, #tpu.memory_space<any>>) dst(%16 : memref<1x128xf32, #tpu.memory_space<any>>)
    %c1_i32_9 = arith.constant 1 : i32
    %c0_i32_10 = arith.constant 0 : i32
    %19 = tpu.memref_slice %arg2[%10, %c0_i32_10] : memref<1000x128xf32, #tpu.memory_space<any>> -> memref<1x128xf32, #tpu.memory_space<any>>
    %c0_i32_11 = arith.constant 0 : i32
    %20 = tpu.memref_slice %arg3[%8, %c0_i32_11] : memref<2x128xf32, #tpu.memory_space<any>> -> memref<1x128xf32, #tpu.memory_space<any>>
    %21 = tpu.memref_slice %arg4[%c1_i32_9] : memref<2x!tpu.dma_semaphore, #tpu.memory_space<semaphore_mem>> -> memref<1x!tpu.dma_semaphore, #tpu.memory_space<semaphore_mem>>
    %22 = tpu.memref_squeeze %21 : memref<1x!tpu.dma_semaphore, #tpu.memory_space<semaphore_mem>> -> memref<!tpu.dma_semaphore, #tpu.memory_space<semaphore_mem>>
    tpu.wait_dma2 semaphore(%22 : memref<!tpu.dma_semaphore, #tpu.memory_space<semaphore_mem>>) src(%19 : memref<1x128xf32, #tpu.memory_space<any>>) dst(%20 : memref<1x128xf32, #tpu.memory_space<any>>)
    return
  }
}

</mosaic_0001>

<bundles_post_ra>
// kernel: tpu_custom_call.1
= control target key start
LH: loop header
LB: loop body
LE: loop exit
PB: predicated region body
PF: predicated region fallthrough
CT: control target
= control target key end

     0   :  { %s145_s0 = inlined_call_operand.hbm [shape: s32[2], index: 0, kind: input, shape index: {}]   ;;  %s146_s1 = inlined_call_operand.hbm [shape: f32[1000,128], index: 1, kind: input, shape index: {}]   ;;  %s147_s2 = inlined_call_operand.hbm [shape: f32[2,128], index: 2, kind: output, shape index: {}]  }
   0x1   :  { %s84_s11 = scalar_lea.hbm %s145_s0, 16 }
   0x2   :  { %p85_p0 = scmp.ne.s32.totalorder %s145_s0, %s84_s11  ;;  %p88_p1 = scmp.lt.u32.totalorder %s84_s11, %s145_s0 }
   0x4   :  { %p90_p2 = pnand %p88_p1, %p85_p0 }
   0x6   :  { %93 = shalt.err (!%p90_p2)  }
   0x7   :  { %s100_s16 = smov [#allocation4]  }
   0x8   :  { %8 = dma.hbm_to_smem %s145_s0, 16, %s100_s16, [#allocation3] }
   0x9   :  { %94 = dma.done.wait [#allocation3], 16 }
   0xa   :  { %95 = vsyncadd [#allocation3], 4294967280 }
   0xb   :  { %10 = sfence }
   0xc   :  { %s12_s19 = sld [smem:[#allocation4]]  ;;  %s101_s24 = smov [#allocation2]  }
   0xd   :  { %s102_s25 = smov [#allocation5]   ;;  %s103_s26 = smov 0  }
   0xe   :  { %s72_s0 = scalar_lea.hbm %s147_s2, 16  ;;  %s104_s8 = smov [#allocation2 + $0x1]  }
   0xf   :  { %s105_s9 = smov [#allocation7]  }
  0x12   :  { %s73_s20 = sshll.u32 %s12_s19, 4 }
  0x13   :  { %s14_s23 = scalar_lea.hbm %s146_s1, %s73_s20 }
  0x14   :  { %29 = dma.general %s14_s23, 16, %s147_s2, %s101_s24, %s102_s25, [#allocation6], %s103_s26, 0  }
  0x15   :  { %s74_s29 = sld [smem:[#allocation4 + $0x1]] }
  0x1b   :  { %s75_s4 = sshll.u32 %s74_s29, 4 }
  0x1c   :  { %s33_s7 = scalar_lea.hbm %s146_s1, %s75_s4 }
  0x1d   :  { %49 = dma.general %s33_s7, 16, %s72_s0, %s104_s8, %s105_s9, [#allocation8], %s103_s26, 0  }
  0x1e   :  { %96 = dma.done.wait [#allocation2], 16 }
  0x1f   :  { %97 = vsyncadd [#allocation2], 4294967280 }
  0x20   :  { %98 = dma.done.wait [#allocation2 + $0x1], 16 }
  0x21   :  { %99 = vsyncadd [#allocation2 + $0x1], 4294967280 }
  0x22   :  { %55 = vsyncmov [#allocation2] }
  0x25   :  { %s56_s10 = vpop.sfrf %55 }
  0x26   :  { %p76_p3 = scmp.ne.s32.totalorder %s56_s10, 0 }
  0x28   :  { %60 = shalt.err (%p76_p3)  }
  0x29   :  { %62 = vsyncmov [#allocation2 + $0x1] }
  0x2c   :  { %s63_s11 = vpop.sfrf %62 }
  0x2d   :  { %p77_p4 = scmp.ne.s32.totalorder %s63_s11, 0 }
  0x2f   :  { %67 = shalt.err (%p77_p4)  }

</bundles_post_ra>
